<compile_context>
chip_gen: v5e
topology: v5e:2x2
jax: 0.10.0
libtpu: 0.0.40
codegen_flags: <defaults>
</compile_context>

<pallas_src>
import functools

import jax
import jax.numpy as jnp
from jax.experimental import pallas as pl
from jax.experimental.pallas import tpu as pltpu


def _linear_add_kernel(x_ref, w_ref, b_ref, other_ref, o_ref):
    # x: (B, E), w: (E, C) [pre-transposed once at init], b: (1, C), other: (B, C)
    y = jnp.dot(x_ref[...], w_ref[...], preferred_element_type=jnp.float32)
    # Bias + residual add in f32; single cast at the final store.
    y = y + b_ref[...] + other_ref[...]
    o_ref[...] = y.astype(o_ref.dtype)


def _build_call(B, E, C, dtype):
    # Everything is tiny: each operand is one whole-array VMEM-resident block,
    # single (implicit) grid point, one DMA per operand.
    vmem = pl.BlockSpec(memory_space=pltpu.MemorySpace.VMEM)
    cost = pl.CostEstimate(
        flops=2 * B * C * E,
        transcendentals=0,
        bytes_accessed=(B * E + E * C + C + 2 * B * C) * 4,
    )
    return pl.pallas_call(
        _linear_add_kernel,
        out_shape=jax.ShapeDtypeStruct((B, C), dtype),
        in_specs=[vmem, vmem, vmem, vmem],
        out_specs=vmem,
        # `other` shares the HBM buffer with the output -> one fewer HBM
        # allocation / copy on a 100% dispatch/DMA-bound problem.
        input_output_aliases={3: 0},
        cost_estimate=cost,
    )


@functools.partial(jax.jit, donate_argnums=(3,))
def linear_add(x1, w_ec, bias2d, other):
    """x1: (B, E), w_ec: (E, C) [pre-transposed], bias2d: (1, C), other: (B, C)."""
    B, E = x1.shape
    C = w_ec.shape[1]
    return _build_call(B, E, C, x1.dtype)(x1, w_ec, bias2d, other)


def init_params(key, embedding_size, number_of_classes):
    """One-time parameter setup (mirrors nn.Linear init).

    Returns the weight already transposed to (E, C) and the bias pre-shaped to
    (1, C) so no per-call glue ops are needed.
    """
    k_w, k_b = jax.random.split(key)
    bound = 1.0 / jnp.sqrt(embedding_size)
    weight = jax.random.uniform(
        k_w, (number_of_classes, embedding_size),
        minval=-bound, maxval=bound, dtype=jnp.float32)            # (C, E) PyTorch layout
    bias = jax.random.uniform(
        k_b, (number_of_classes,),
        minval=-bound, maxval=bound, dtype=jnp.float32)
    w_ec = jnp.asarray(weight.T)                                   # (E, C), done once
    bias2d = bias.reshape(1, number_of_classes)                    # (1, C), done once
    return weight, w_ec, bias2d


if __name__ == "__main__":
    key = jax.random.PRNGKey(0)
    k_x, k_o, k_p = jax.random.split(key, 3)

    embedding_size = 10
    number_of_classes = 10
    batch = 1

    # Deterministic inputs matching the PyTorch module's shapes.
    x1 = jax.random.normal(k_x, (batch, embedding_size), dtype=jnp.float32)
    other = jax.random.normal(k_o, (batch, number_of_classes), dtype=jnp.float32)

    weight, w_ec, bias2d = init_params(k_p, embedding_size, number_of_classes)

    # Reference (PyTorch semantics: x @ W.T + b + other) computed BEFORE the
    # kernel call because `other` is donated/aliased into the kernel's output.
    ref = x1 @ weight.T + bias2d + other
    ref = jax.block_until_ready(ref)

    out = linear_add(x1, w_ec, bias2d, other)
    out = jax.block_until_ready(out)

    assert out.shape == (batch, number_of_classes)
    assert jnp.allclose(out, ref, atol=1e-5, rtol=1e-5)

    print("KERNEL_OK")
</pallas_src>

<mosaic_0001>
module attributes {stable_mosaic.version = 11 : i64} {
  func.func @_linear_add_kernel(%arg0: memref<1x10xf32, #tpu.memory_space<vmem>>, %arg1: memref<10x10xf32, #tpu.memory_space<vmem>>, %arg2: memref<1x10xf32, #tpu.memory_space<vmem>>, %arg3: memref<1x10xf32, #tpu.memory_space<vmem>>, %arg4: memref<1x10xf32, #tpu.memory_space<vmem>>) attributes {dimension_semantics = [], scalar_prefetch = 0 : i64, scratch_operands = 0 : i64, tpu.core_type = #tpu.core_type<tc>} {
    %c0 = arith.constant 0 : index
    %c0_0 = arith.constant 0 : index
    %0 = vector.load %arg0[%c0, %c0_0] : memref<1x10xf32, #tpu.memory_space<vmem>>, vector<1x10xf32>
    %c0_1 = arith.constant 0 : index
    %c0_2 = arith.constant 0 : index
    %1 = vector.load %arg1[%c0_1, %c0_2] : memref<10x10xf32, #tpu.memory_space<vmem>>, vector<10x10xf32>
    %cst = arith.constant dense<0.000000e+00> : vector<1x10xf32>
    %2 = tpu.matmul %0, %1, %cst {dimension_numbers = #tpu.dot_dimension_numbers<[1], [0], [0], [1], [0, 0, 1, 1], [], []>} : vector<1x10xf32>, vector<10x10xf32>, vector<1x10xf32> -> vector<1x10xf32>
    %c0_3 = arith.constant 0 : index
    %c0_4 = arith.constant 0 : index
    %3 = vector.load %arg2[%c0_3, %c0_4] : memref<1x10xf32, #tpu.memory_space<vmem>>, vector<1x10xf32>
    %4 = arith.addf %2, %3 : vector<1x10xf32>
    %c0_5 = arith.constant 0 : index
    %c0_6 = arith.constant 0 : index
    %5 = vector.load %arg3[%c0_5, %c0_6] : memref<1x10xf32, #tpu.memory_space<vmem>>, vector<1x10xf32>
    %6 = arith.addf %4, %5 : vector<1x10xf32>
    %c0_7 = arith.constant 0 : index
    %c0_8 = arith.constant 0 : index
    %7 = vector.load %arg4[%c0_7, %c0_8] : memref<1x10xf32, #tpu.memory_space<vmem>>, vector<1x10xf32>
    tpu.vector_store %arg4[%c0_7, %c0_8], %6 {strides = array<i32>} : memref<1x10xf32, #tpu.memory_space<vmem>>, vector<1x10xf32>,
    return
  }
}

</mosaic_0001>

<bundles_post_ra>
// kernel: linear_add.1
= control target key start
LH: loop header
LB: loop body
LE: loop exit
PB: predicated region body
PF: predicated region fallthrough
CT: control target
= control target key end

     0   :  { %9 = vsyncpa [#allocation3], 0  ;;  %s271_s0 = inlined_call_operand.hbm [shape: f32[1,10], index: 0, kind: input, shape index: {}]   ;;  %s272_s1 = inlined_call_operand.hbm [shape: f32[10,10], index: 1, kind: input, shape index: {}]   ;;  %s273_s2 = inlined_call_operand.vmem [shape: f32[1,10], index: 2, kind: input, shape index: {}]   ;;  %s274_s3 = inlined_call_operand.hbm [shape: f32[1,10], index: 3, kind: input, shape index: {}, may-alias: {3,4}]   ;;  %s275_s4 = inlined_call_operand.hbm [shape: f32[1,10], index: 4, kind: output, shape index: {}, may-alias: {3,4}]  }
   0x1   :  { %10 = vsyncpa [#allocation6], 0  ;;  %s27_s17 = sshll.u32 %s272_s1, 4  ;;  %s28_s17 = int_to_ptr.hbm [resolvable:$true] %s27_s17 }
   0x2   :  { %11 = vsyncpa [#allocation4], 0  ;;  %s225_s18 = smov [#allocation5]   ;;  %s17_s22 = sshll.u32 %s271_s0, 4  ;;  %s18_s22 = int_to_ptr.hbm [resolvable:$true] %s17_s22 }
   0x3   :  { %s29_s19 = sshll.u32 %s225_s18, 4  ;;  %s226_s23 = smov 128   ;;  %s30_s19 = int_to_ptr.vmem [resolvable:$true] %s29_s19 }
   0x4   :  { %s227_s24 = smov 8   ;;  %s228_s25 = smov [#allocation2]  }
   0x5   :  { %35 = dma.hbm_to_vmem [thread:$0]  %s28_s17, 256, %s30_s19, [#allocation6], %s226_s23, %s226_s23, %s227_s24  }
   0x6   :  { %s19_s26 = sshll.u32 %s228_s25, 4  ;;  %s43_s29 = sshll.u32 %s274_s3, 4  ;;  %s20_s26 = int_to_ptr.vmem [resolvable:$true] %s19_s26  ;;  %s44_s29 = int_to_ptr.hbm [resolvable:$true] %s43_s29 }
   0x7   :  { %22 = dma.hbm_to_vmem [thread:$0]  %s18_s22, 16, %s20_s26, [#allocation3]  }
   0x8   :  { %s229_s1 = smov [#allocation7]  }
   0x9   :  { %s45_s30 = sshll.u32 %s229_s1, 4  ;;  %s46_s30 = int_to_ptr.vmem [resolvable:$true] %s45_s30 }
   0xa   :  { %48 = dma.hbm_to_vmem [thread:$0]  %s44_s29, 16, %s46_s30, [#allocation6]  }
   0xb   :  { %219 = dma.done.wait [#allocation3], 16  }
   0xc   :  { %220 = vsyncadd [#allocation3], 4294967280 }
   0xd   :  { %221 = dma.done.wait [#allocation6], 272  }
   0xe   :  { %222 = vsyncadd [#allocation6], 4294967024  ;;  %vm69_vm0 = vcmask 1041408   ;;  %v63_v0 = vld [vmem:[#allocation5 + $0x8] sm:$0x3]  ;;  %v62_v1 = vld [vmem:[#allocation5] sm:$0xff] }
   0xf   :  { %115 = vmatpush.msk.msra.mxu0 %vm69_vm0, %v63_v0  ;;  %v61_v2 = vld [vmem:[#allocation2] sm:$0x1]  ;;  %vm65_vm1 = vcmask 80896   ;;  %v93_v5 = vld [vmem:[#allocation7] sm:$0x1]  ;;  %s230_s5 = smov [#allocation8]  }
  0x10   :  { %v64_v3 = vld [vmem:[%s273_s2] sm:$0x1]  ;;  %s102_s6 = sshll.u32 %s230_s5, 4  ;;  %s104_s9 = sshll.u32 %s275_s4, 4  ;;  %vm95_vm2 = vcmask 73728   ;;  %s103_s6 = int_to_ptr.vmem [resolvable:$true] %s102_s6  ;;  %s105_s9 = int_to_ptr.hbm [resolvable:$true] %s104_s9 }
  0x11   :  { %88 = vmatpush.msra.mxu0 %v62_v1 }
  0x12   :  { %116 = vmatmul.msk.f32.vlgmr.msra.gmra.mxu0 %vm65_vm1, %v61_v2 }
  0x8f   :  { %v90_v4 = vpop.f32.mrf.mxu0 }
  0x90   :  { %v91_v6 = vadd.f32 %v90_v4, %v64_v3 }
  0x92   :  { %v94_v7 = vadd.f32 %v93_v5, %v91_v6 }
  0x94   :  { %96 = vst.msk [vmem:[#allocation8] sm:$0x1] %vm95_vm2, %v94_v7 }
  0x95   :  { %107 = dma.vmem_to_hbm [thread:$0]  %s103_s6, 16, %s105_s9, [#allocation4]  }
  0x96   :  { %223 = dma.done.wait [#allocation4], 16  }
  0x97   :  { %224 = vsyncadd [#allocation4], 4294967280 }
  0x98   :  { %112 = vsyncpa [#allocation3], 1 }
  0x99   :  { %113 = vsyncpa [#allocation6], 1 }
  0x9a   :  { %114 = vsyncpa [#allocation4], 1 }

</bundles_post_ra>
